<compile_context>
chip_gen: v6e
topology: v6e:2x2x1
jax: 0.10.0
libtpu: 0.0.40
codegen_flags: <defaults>
</compile_context>

<pallas_src>
import math

import jax
import jax.numpy as jnp
from jax.experimental import pallas as pl
from jax.experimental.pallas import tpu as pltpu

# --------------------------------------------------------------------------
# Tunables
_BLOCK_BYTE_TARGET = 4 * 1024 * 1024    # ~4 MiB per x block (~85% HBM roofline)
_SMALL_BYPASS_BYTES = 1 * 1024 * 1024   # below this, plain XLA beats kernel overhead
_VMEM_LIMIT_BYTES = 48 * 1024 * 1024    # covers 2 arrays x 2 bufs x 4 MiB + headroom;
                                        # < physical VMEM on v5e/v6e/v7x


def _drop_path_kernel(scale_ref, x_ref, o_ref):
    # Per-row broadcast multiply: exactly one VPU multiply per vreg (HBM bound).
    # scale stays f32 (exact 1/keep_prob); cast back to storage dtype on store.
    o_ref[...] = (x_ref[...] * scale_ref[...]).astype(o_ref.dtype)


def _sublane_align(dtype) -> int:
    """Second-minor (sublane) alignment: 8 for 32-bit, 16 for 16-bit, 32 for 8-bit."""
    bits = jnp.dtype(dtype).itemsize * 8
    return max(8, 256 // bits)


def _pick_tiles(rows, cols, itemsize, row_align):
    """Bytes-based block sizing targeting ~_BLOCK_BYTE_TARGET per x block.

    Lane tile is a multiple of 128 (or the full extent if cols < 128); row tile
    is a multiple of `row_align` (or the full extent).  The grid uses cdiv, so
    tiles need not divide the extents (Pallas masks the ragged edge blocks)."""
    target_elems = max(1, _BLOCK_BYTE_TARGET // itemsize)

    if cols <= 128:
        tile_f = cols
    else:
        tile_f = min(cols, max(128, target_elems // row_align))
        tile_f = (tile_f // 128) * 128

    if rows <= row_align:
        tile_r = rows
    else:
        tile_r = min(rows, max(row_align, target_elems // tile_f))
        tile_r = (tile_r // row_align) * row_align

    n_r, n_f = pl.cdiv(rows, tile_r), pl.cdiv(cols, tile_f)
    # Megacore balance (v7x): if everything fits in a single block, split the
    # lane axis so both TensorCores get work on this bandwidth-bound op.
    if n_r == 1 and n_f == 1 and cols >= 256:
        tile_f = max(128, (cols // 2 // 128) * 128)
        n_f = pl.cdiv(cols, tile_f)
    return tile_r, tile_f, (n_r, n_f)


def drop_path(x, drop_prob: float = 0.0, training: bool = False, seed: int = 0,
              *, key=None, donate_x: bool = False):
    """DropPath forward. x is NCHW (or any N-leading shape)."""
    if drop_prob == 0.0 or not training:
        return x
    if drop_prob >= 1.0:
        # torch's x.div(keep_prob=0) would produce inf/NaN; return zeros explicitly.
        return jnp.zeros_like(x)

    keep_prob = 1.0 - float(drop_prob)
    n = x.shape[0]
    feat = math.prod(x.shape[1:])

    # Per-sample scale: floor(keep_prob + U) in {0,1}, scaled by 1/keep_prob.
    # N scalars -> computed outside the kernel (no in-kernel PRNG needed).
    if key is None:
        key = jax.random.PRNGKey(seed)
    u = jax.random.uniform(key, (n,), dtype=jnp.float32)
    scale = jnp.floor(keep_prob + u) * (1.0 / keep_prob)      # f32, exact

    # Small tensors: fixed pallas_call / grid-step overhead dominates; XLA fuses
    # the broadcast multiply and hits roofline with zero kernel overhead.
    if x.size * x.dtype.itemsize < _SMALL_BYPASS_BYTES:
        bshape = (n,) + (1,) * (x.ndim - 1)
        return (x * scale.reshape(bshape)).astype(x.dtype)

    # Sublane packing for small batches: view (n, feat) as (n*R, feat//R) so the
    # sublane dim reaches the packing width while the lane dim stays 128-dense.
    row_align = _sublane_align(x.dtype)
    R = 1
    if n < row_align:
        for cand in range(max(1, row_align // n), 0, -1):
            if feat % cand == 0 and (feat // cand) % 128 == 0:
                R = cand
                break
    rows, cols = n * R, feat // R

    x2d = x.reshape(rows, cols)
    scale_col = jnp.repeat(scale, R).reshape(rows, 1)          # stays f32

    tile_r, tile_f, grid = _pick_tiles(rows, cols, x.dtype.itemsize, row_align)

    out2d = pl.pallas_call(
        _drop_path_kernel,
        out_shape=jax.ShapeDtypeStruct((rows, cols), x.dtype),
        grid=grid,
        in_specs=[
            pl.BlockSpec((tile_r, 1), lambda i, j: (i, 0)),
            pl.BlockSpec((tile_r, tile_f), lambda i, j: (i, j)),
        ],
        out_specs=pl.BlockSpec((tile_r, tile_f), lambda i, j: (i, j)),
        input_output_aliases=({1: 0} if donate_x else {}),
        compiler_params=pltpu.CompilerParams(
            dimension_semantics=("parallel", "parallel"),
            vmem_limit_bytes=_VMEM_LIMIT_BYTES,
        ),
    )(scale_col, x2d)

    return out2d.reshape(x.shape)


class DropPath:
    """JAX/Pallas counterpart of the PyTorch DropPath module."""

    def __init__(self, drop_prob=None):
        self.drop_prob = 0.0 if drop_prob is None else float(drop_prob)
        self.training = True

    def __call__(self, x, seed: int = 0, *, key=None):
        return drop_path(x, self.drop_prob, self.training, seed=seed, key=key)


def _check_per_sample(x, y, keep_prob):
    # Each sample must be exactly 0 or x / keep_prob.
    for i in range(x.shape[0]):
        yi = y[i]
        is_zero = bool(jnp.allclose(yi, 0.0))
        is_scaled = bool(jnp.allclose(yi, x[i] / keep_prob, rtol=1e-5, atol=1e-5))
        assert is_zero or is_scaled, "per-sample mask semantics violated"


if __name__ == "__main__":
    root = jax.random.PRNGKey(0)
    k1, k2 = jax.random.split(root)

    module = DropPath(drop_prob=0.3)
    module.training = True
    keep_prob = 1.0 - module.drop_prob

    # Tiny NCHW input (typical module call site) -> small-tensor XLA bypass.
    x_small = jax.random.normal(k1, (2, 4, 16, 16), dtype=jnp.float32)
    y_small = jax.block_until_ready(module(x_small, seed=42))
    _check_per_sample(x_small, y_small, keep_prob)

    # Moderately sized NCHW input (2 MiB) -> exercises the Pallas tiled kernel.
    x_big = jax.random.normal(k2, (8, 64, 32, 32), dtype=jnp.float32)
    y_big = jax.block_until_ready(module(x_big, seed=7))
    _check_per_sample(x_big, y_big, keep_prob)

    # Eval / drop_prob=0 path is identity.
    module.training = False
    y_eval = jax.block_until_ready(module(x_small))
    assert bool(jnp.array_equal(y_eval, x_small))

    print("KERNEL_OK")
</pallas_src>

<mosaic_0001>
module attributes {stable_mosaic.version = 11 : i64} {
  func.func @_drop_path_kernel(%arg0: i32, %arg1: i32, %arg2: memref<8x1xf32, #tpu.memory_space<vmem>>, %arg3: memref<8x32768xf32, #tpu.memory_space<vmem>>, %arg4: memref<8x32768xf32, #tpu.memory_space<vmem>>) attributes {dimension_semantics = [#tpu.dimension_semantics<parallel>, #tpu.dimension_semantics<parallel>], iteration_bounds = array<i64: 1, 2>, scalar_prefetch = 0 : i64, scratch_operands = 0 : i64, tpu.core_type = #tpu.core_type<tc>, window_params = [{transform_indices = @transform_0, window_bounds = array<i64: 8, 1>}, {transform_indices = @transform_1, window_bounds = array<i64: 8, 32768>}, {transform_indices = @transform_2, window_bounds = array<i64: 8, 32768>}]} {
    %c0 = arith.constant 0 : index
    %c0_0 = arith.constant 0 : index
    %0 = vector.load %arg3[%c0, %c0_0] : memref<8x32768xf32, #tpu.memory_space<vmem>>, vector<8x32768xf32>
    %c0_1 = arith.constant 0 : index
    %c0_2 = arith.constant 0 : index
    %1 = vector.load %arg2[%c0_1, %c0_2] : memref<8x1xf32, #tpu.memory_space<vmem>>, vector<8x1xf32>
    %2 = vector.broadcast %1 : vector<8x1xf32> to vector<8x32768xf32>
    %3 = arith.mulf %0, %2 : vector<8x32768xf32>
    %c0_3 = arith.constant 0 : index
    %c0_4 = arith.constant 0 : index
    %4 = vector.load %arg4[%c0_3, %c0_4] : memref<8x32768xf32, #tpu.memory_space<vmem>>, vector<8x32768xf32>
    tpu.vector_store %arg4[%c0_3, %c0_4], %3 {strides = array<i32>} : memref<8x32768xf32, #tpu.memory_space<vmem>>, vector<8x32768xf32>,
    return
  }
  func.func @transform_0(%arg0: i32, %arg1: i32) -> (i32, i32) {
    %c0_i32 = arith.constant 0 : i32
    %c0_i32_0 = arith.constant 0 : i32
    return %arg0, %c0_i32 : i32, i32
  }
  func.func @transform_1(%arg0: i32, %arg1: i32) -> (i32, i32) {
    %c0_i32 = arith.constant 0 : i32
    return %arg0, %arg1 : i32, i32
  }
  func.func @transform_2(%arg0: i32, %arg1: i32) -> (i32, i32) {
    %c0_i32 = arith.constant 0 : i32
    return %arg0, %arg1 : i32, i32
  }
}

</mosaic_0001>

<bundles_post_ra>
// kernel: tpu_custom_call.1
= control target key start
LH: loop header
LB: loop body
LE: loop exit
PB: predicated region body
PF: predicated region fallthrough
CT: control target
= control target key end

     0   :  { %7 = vsyncpa [#allocation3], 0  ;;  %s2789_s0 = inlined_call_operand.vmem [shape: f32[8,1], index: 0, kind: input, shape index: {}]   ;;  %s2790_s1 = inlined_call_operand.hbm [shape: f32[8,65536], index: 1, kind: input, shape index: {}]   ;;  %s2791_s2 = inlined_call_operand.hbm [shape: f32[8,65536], index: 2, kind: output, shape index: {}]  }
   0x1   :  { %9 = vsyncpa [#allocation3 + $0x1], 0 }
   0x2   :  { %10 = vsyncpa [#allocation4], 0 }
   0x3   :  { %12 = vsyncpa [#allocation4 + $0x1], 0  ;;  %s1297_s9 = smov 0   ;;  %s1299_s10 = smov 0  }
   0x4   :  { %s1301_s11 = smov 0   ;;  %s1303_s12 = smov 0  }
   0x5   :  { %s1305_s13 = smov 0   ;;  %s1307_s14 = smov 0  }
   0x6 LB: > { %s1087_s15 = sadd.s32 4294967295, %s1277_s14   ;;  %s1088_s16 = sadd.s32 4294967294, %s1277_s14   ;;  %s1277_s14 = sphi %s1307_s14, %s18_s14   ;;  %s1273_s13 = sphi %s1305_s13, %s2803_s13   ;;  %s1269_s12 = sphi %s1303_s12, %s2802_s12   ;;  %s1265_s11 = sphi %s1301_s11, %s2801_s11   ;;  %s1261_s10 = sphi %s1299_s10, %s2800_s10   ;;  %s1257_s9 = sphi %s1297_s9, %s2799_s9  }
   0x7   : > { %s27_s17 = sadd.s32 1, %s1273_s13  ;;  %s65_s18 = sadd.s32 1, %s1265_s11 }
   0x8   : > { %p28_p0 = scmp.ge.s32.totalorder %s27_s17, 2  ;;  %p72_p1 = scmp.ne.s32.totalorder %s1265_s11, %s1261_s10 }
   0x9   : > { %p73_p2 = scmp.eq.s32.totalorder %s1277_s14, 0  ;;  %p78_p3 = scmp.ne.s32.totalorder %s1261_s10, %s1257_s9 }
   0xa   : > { %s2805_s17 = smov (%p28_p0, %s27_s17), 0  ;;  %p79_p5 = scmp.eq.s32.totalorder %s1087_s15, 0 }
   0xb   : > { %p1338_p4 = por %p73_p2, %p72_p1  ;;  %s61_s20 = ssub.s32 %s1273_s13, %s2805_s17 }
   0xc   : > { %p104_p6 = scmp.eq.s32.totalorder %s1087_s15, 1  ;;  %p63_p7 = scmp.eq.s32.totalorder %s61_s20, 0 }
   0xd   : > { %p1344_p8 = por %p79_p5, %p78_p3  ;;  %p110_p10 = scmp.eq.s32.totalorder %s1088_s16, 1 }
   0xe   : > { %p1348_p9 = por %p104_p6, %p72_p1  ;;  %p1117_p13 = scmp.lt.s32.totalorder %s1277_s14, 2 }
   0xf   : > { %s1353_s23 = scalar_select %p63_p7, %s1265_s11, %s65_s18  }
  0x10   : > { %p1355_p11 = por %p110_p10, %p78_p3  ;;  %s137_s25 = sand.u32 1, %s1265_s11  }
  0x11   : > { %s1092_s26 = sshll.u32 %s137_s25, 11  ;;  %s1103_s27 = sshll.u32 %s1273_s13, 15 }
  0x12   : > { %s2795_s24 = scalar_select %p1355_p11, 1, 0 }
  0x13   : > { %s149_s30 = scalar_lea.hbm %s2790_s1, %s1103_s27  ;;  %s141_s3 = scalar_lea.vmem [#allocation2], %s1092_s26 }
  0x14   : > { %s151_s4 = sshll.u32 %s141_s3, 4  ;;  %p1368_p0 = pnand %p1117_p13, %p1338_p4  ;;  %s152_s4 = int_to_ptr.vmem [resolvable:$true] %s151_s4 }
  0x15   : > { %p1095_p1 = scmp.ge.s32.totalorder %s1277_s14, 1  ;;  %p156_p2 = scmp.lt.s32.totalorder %s1277_s14, 3 }
  0x16   : > { %s138_s6 = scalar_lea.sflag [#allocation3], %s137_s25  ;;  %p1171_p3 = pneg %p1368_p0 }
  0x17   : > { %s1182_s7 = scalar_lea.vmem %s152_s4, 32768  ;;  %s1279_s8 = smov [#allocation2]  }
  0x18   : > { %p1183_p5 = scmp.ne.s32.totalorder %s152_s4, %s1182_s7  ;;  %s1187_s15 = sshll.u32 %s1279_s8, 4  ;;  %s1188_s15 = int_to_ptr.vmem [resolvable:$false] %s1187_s15 }
  0x19   : > { %s1189_s16 = scalar_lea.vmem %s1188_s15, 65536  ;;  %p1190_p10 = scmp.lt.s32.totalorder %s152_s4, %s1188_s15 }
  0x1a   : > { %p1185_p6 = pnand %p1183_p5, %p1171_p3  ;;  %p1191_p12 = scmp.lt.s32.totalorder %s1189_s16, %s1182_s7 }
  0x1c   : > { %p1186_p7 = pneg %p1185_p6  ;;  %p1192_p4 = por %p1191_p12, %p1190_p10 }
  0x1e   : > { %p1193_p13 = pnand %p1192_p4, %p1186_p7 }
  0x20   : > { %1196 = shalt.err (!%p1193_p13)
}
  0x21   : > { %1112 = dma.hbm_to_vmem [thread:$0]  (!%p1368_p0), %s149_s30, 32768, %s152_s4, %s138_s6  }
  0x22   : > { %p157_p11 = pnand %p1095_p1, %p156_p2 }
  0x23   : > { %s1383_s18 = sand.u32 (!%p157_p11), 1, %s1261_s10  }
  0x24   : > { %160 = sbr.rel (%p157_p11) target bundleno = 311 (0x137), region = 28  ;;  %s1096_s19 = sshll.u32 (!%p157_p11), %s1383_s18, 11 }
  0x25   : > { %s163_s20 = scalar_lea.sflag (!%p157_p11), [#allocation3], %s1383_s18  ;;  %s1389_s25 = scalar_lea.vmem (!%p157_p11), [#allocation2], %s1096_s19 }
  0x29   : > { %1248 = dma.done.wait (%p1344_p8), %s163_s20, 32768  }
  0x2a   : > { %1250 = vsyncadd (%p1344_p8), %s163_s20, 4294934528  ;;  %v1280_v0 = vmov 0   ;;  %v453_v1 = vld [vmem:[%s2789_s0] sm:$0xff]  ;;  %v198_v3 = vld [vmem:[%s1389_s25 + $0x8] sm:$0xff]  ;;  %s1454_s21 = scalar_lea.vmem [#allocation5], %s1096_s19  ;;  %s1104_s28 = sshll.u32 %s1269_s12, 15 }
  0x2b   : > { %1168 = vset.pattern.permute.xlu0 %v1280_v0  ;;  %v197_v2 = vld [vmem:[%s1389_s25] sm:$0xff]  ;;  %v199_v4 = vld [vmem:[%s1389_s25 + $0x10] sm:$0xff]  ;;  %v200_v5 = vld [vmem:[%s1389_s25 + $0x18] sm:$0xff]  ;;  %s988_s29 = sshll.u32 %s1454_s21, 4  ;;  %s2733_s3 = scalar_lea.hbm %s2791_s2, %s1104_s28  ;;  %s2735_s29 = int_to_ptr.vmem [resolvable:$true] %s988_s29 }
  0x2c   : > { %456 = vperm.xlu0 %1168, %v453_v1   ;;  %v201_v6 = vld [vmem:[%s1389_s25 + $0x20] sm:$0xff]  ;;  %v202_v7 = vld [vmem:[%s1389_s25 + $0x28] sm:$0xff]  ;;  %v203_v8 = vld [vmem:[%s1389_s25 + $0x30] sm:$0xff]  ;;  %s972_s4 = scalar_lea.sflag [#allocation4], %s1383_s18  ;;  %s1197_s5 = scalar_lea.vmem %s2735_s29, 32768 }
  0x2d   : > { %v204_v9 = vld [vmem:[%s1389_s25 + $0x38] sm:$0xff]  ;;  %v205_v10 = vld [vmem:[%s1389_s25 + $0x40] sm:$0xff]  ;;  %v206_v11 = vld [vmem:[%s1389_s25 + $0x48] sm:$0xff]  ;;  %p1198_p8 = scmp.ne.s32.totalorder %s2735_s29, %s1197_s5  ;;  %s1281_s6 = smov [#allocation5]  }
  0x2e   : > { %v207_v12 = vld [vmem:[%s1389_s25 + $0x50] sm:$0xff]  ;;  %v208_v13 = vld [vmem:[%s1389_s25 + $0x58] sm:$0xff]  ;;  %v209_v14 = vld [vmem:[%s1389_s25 + $0x60] sm:$0xff]  ;;  %s1201_s7 = sshll.u32 %s1281_s6, 4  ;;  %s1202_s7 = int_to_ptr.vmem [resolvable:$false] %s1201_s7 }
  0x2f   : > { %v210_v15 = vld [vmem:[%s1389_s25 + $0x68] sm:$0xff]  ;;  %v211_v16 = vld [vmem:[%s1389_s25 + $0x70] sm:$0xff]  ;;  %v212_v17 = vld [vmem:[%s1389_s25 + $0x78] sm:$0xff]  ;;  %p1199_p11 = pnand %p1198_p8, %p1348_p9  ;;  %s1203_s8 = scalar_lea.vmem %s1202_s7, 65536 }
  0x30   : > { %v213_v19 = vld [vmem:[%s1389_s25 + $0x80] sm:$0xff]  ;;  %v214_v20 = vld [vmem:[%s1389_s25 + $0x88] sm:$0xff]  ;;  %v215_v21 = vld [vmem:[%s1389_s25 + $0x90] sm:$0xff]  ;;  %p1204_p0 = scmp.lt.s32.totalorder %s2735_s29, %s1202_s7  ;;  %p1205_p1 = scmp.lt.s32.totalorder %s1203_s8, %s1197_s5 }
  0x31   : > { %v216_v22 = vld [vmem:[%s1389_s25 + $0x98] sm:$0xff]  ;;  %v217_v23 = vld [vmem:[%s1389_s25 + $0xa0] sm:$0xff]  ;;  %v218_v24 = vld [vmem:[%s1389_s25 + $0xa8] sm:$0xff]  ;;  %p1200_p12 = pneg %p1199_p11 }
  0x32   : > { %v219_v25 = vld [vmem:[%s1389_s25 + $0xb0] sm:$0xff]  ;;  %v220_v26 = vld [vmem:[%s1389_s25 + $0xb8] sm:$0xff]  ;;  %v221_v31 = vld [vmem:[%s1389_s25 + $0xc0] sm:$0xff]  ;;  %p1206_p2 = por %p1205_p1, %p1204_p0 }
  0x33   : > { %v222_v32 = vld [vmem:[%s1389_s25 + $0xc8] sm:$0xff]  ;;  %v223_v33 = vld [vmem:[%s1389_s25 + $0xd0] sm:$0xff]  ;;  %v224_v34 = vld [vmem:[%s1389_s25 + $0xd8] sm:$0xff] }
  0x34   : > { %v1437_v39 = vld [vmem:[%s1389_s25 + $0xe0] sm:$0xff]  ;;  %v1440_v40 = vld [vmem:[%s1389_s25 + $0xe8] sm:$0xff]  ;;  %v1443_v41 = vld [vmem:[%s1389_s25 + $0xf0] sm:$0xff]  ;;  %p1207_p3 = pnand %p1206_p2, %p1200_p12 }
  0x35   : > { %v1446_v42 = vld [vmem:[%s1389_s25 + $0xf8] sm:$0xff]  ;;  %v1461_v47 = vld [vmem:[%s1389_s25 + $0x100] sm:$0xff]  ;;  %v1464_v48 = vld [vmem:[%s1389_s25 + $0x108] sm:$0xff] }
  0x36   : > { %v1467_v49 = vld [vmem:[%s1389_s25 + $0x110] sm:$0xff]  ;;  %v1470_v50 = vld [vmem:[%s1389_s25 + $0x118] sm:$0xff]  ;;  %v1481_v55 = vld [vmem:[%s1389_s25 + $0x120] sm:$0xff] }
  0x37   : > { %v1484_v56 = vld [vmem:[%s1389_s25 + $0x128] sm:$0xff]  ;;  %v1487_v57 = vld [vmem:[%s1389_s25 + $0x130] sm:$0xff]  ;;  %v1490_v58 = vld [vmem:[%s1389_s25 + $0x138] sm:$0xff] }
  0x38   : > { %v1501_v63 = vld [vmem:[%s1389_s25 + $0x140] sm:$0xff]  ;;  %v1504_v0 = vld [vmem:[%s1389_s25 + $0x148] sm:$0xff]  ;;  %v1507_v1 = vld [vmem:[%s1389_s25 + $0x150] sm:$0xff] }
  0xa7   : > { %v1414_v18 = vpop.permute.xlu0 %456 }
  0xa8   : > { %v459_v27 = vmul.f32 %v1414_v18, %v197_v2  ;;  %v460_v28 = vmul.f32 %v1414_v18, %v198_v3  ;;  %v461_v29 = vmul.f32 %v1414_v18, %v199_v4  ;;  %v462_v30 = vmul.f32 %v1414_v18, %v200_v5  ;;  %v1510_v2 = vld [vmem:[%s1389_s25 + $0x158] sm:$0xff] }
  0xa9   : > { %v463_v35 = vmul.f32 %v1414_v18, %v201_v6  ;;  %v464_v36 = vmul.f32 %v1414_v18, %v202_v7  ;;  %v465_v37 = vmul.f32 %v1414_v18, %v203_v8  ;;  %v466_v38 = vmul.f32 %v1414_v18, %v204_v9  ;;  %v1521_v7 = vld [vmem:[%s1389_s25 + $0x160] sm:$0xff]  ;;  %v1524_v8 = vld [vmem:[%s1389_s25 + $0x168] sm:$0xff]  ;;  %v1527_v9 = vld [vmem:[%s1389_s25 + $0x170] sm:$0xff] }
  0xaa   : > { %v467_v43 = vmul.f32 %v1414_v18, %v205_v10  ;;  %v468_v44 = vmul.f32 %v1414_v18, %v206_v11  ;;  %v469_v45 = vmul.f32 %v1414_v18, %v207_v12  ;;  %v470_v46 = vmul.f32 %v1414_v18, %v208_v13  ;;  %715 = vst [vmem:[%s1454_s21] sm:$0xff] %v459_v27  ;;  %v1530_v10 = vld [vmem:[%s1389_s25 + $0x178] sm:$0xff] }
  0xab   : > { %716 = vst [vmem:[%s1454_s21 + $0x8] sm:$0xff] %v460_v28  ;;  %717 = vst [vmem:[%s1454_s21 + $0x10] sm:$0xff] %v461_v29  ;;  %v471_v51 = vmul.f32 %v1414_v18, %v209_v14  ;;  %v472_v52 = vmul.f32 %v1414_v18, %v210_v15  ;;  %v473_v53 = vmul.f32 %v1414_v18, %v211_v16  ;;  %v1541_v15 = vld [vmem:[%s1389_s25 + $0x180] sm:$0xff]  ;;  %v1544_v16 = vld [vmem:[%s1389_s25 + $0x188] sm:$0xff] }
  0xac   : > { %718 = vst [vmem:[%s1454_s21 + $0x18] sm:$0xff] %v462_v30  ;;  %v474_v54 = vmul.f32 %v1414_v18, %v212_v17  ;;  %719 = vst [vmem:[%s1454_s21 + $0x20] sm:$0xff] %v463_v35  ;;  %v475_v59 = vmul.f32 %v1414_v18, %v213_v19  ;;  %v476_v60 = vmul.f32 %v1414_v18, %v214_v20  ;;  %v1547_v17 = vld [vmem:[%s1389_s25 + $0x190] sm:$0xff]  ;;  %v1550_v19 = vld [vmem:[%s1389_s25 + $0x198] sm:$0xff] }
  0xad   : > { %720 = vst [vmem:[%s1454_s21 + $0x28] sm:$0xff] %v464_v36  ;;  %721 = vst [vmem:[%s1454_s21 + $0x30] sm:$0xff] %v465_v37  ;;  %v477_v61 = vmul.f32 %v1414_v18, %v215_v21  ;;  %v478_v62 = vmul.f32 %v1414_v18, %v216_v22  ;;  %v479_v3 = vmul.f32 %v1414_v18, %v217_v23  ;;  %v1574_v27 = vld [vmem:[%s1389_s25 + $0x1b8] sm:$0xff] }
  0xae   : > { %722 = vst [vmem:[%s1454_s21 + $0x38] sm:$0xff] %v466_v38  ;;  %723 = vst [vmem:[%s1454_s21 + $0x40] sm:$0xff] %v467_v43  ;;  %v480_v4 = vmul.f32 %v1414_v18, %v218_v24  ;;  %v481_v5 = vmul.f32 %v1414_v18, %v219_v25  ;;  %v482_v6 = vmul.f32 %v1414_v18, %v220_v26  ;;  %v1565_v24 = vld [vmem:[%s1389_s25 + $0x1a0] sm:$0xff]  ;;  %v1568_v25 = vld [vmem:[%s1389_s25 + $0x1a8] sm:$0xff] }
  0xaf   : > { %724 = vst [vmem:[%s1454_s21 + $0x48] sm:$0xff] %v468_v44  ;;  %725 = vst [vmem:[%s1454_s21 + $0x50] sm:$0xff] %v469_v45  ;;  %v483_v11 = vmul.f32 %v1414_v18, %v221_v31  ;;  %v484_v12 = vmul.f32 %v1414_v18, %v222_v32  ;;  %v485_v13 = vmul.f32 %v1414_v18, %v223_v33  ;;  %v1571_v26 = vld [vmem:[%s1389_s25 + $0x1b0] sm:$0xff]  ;;  %v1589_v32 = vld [vmem:[%s1389_s25 + $0x1c0] sm:$0xff] }
  0xb0   : > { %726 = vst [vmem:[%s1454_s21 + $0x58] sm:$0xff] %v470_v46  ;;  %727 = vst [vmem:[%s1454_s21 + $0x60] sm:$0xff] %v471_v51  ;;  %v486_v14 = vmul.f32 %v1414_v18, %v224_v34  ;;  %v487_v20 = vmul.f32 %v1414_v18, %v1437_v39  ;;  %v488_v21 = vmul.f32 %v1414_v18, %v1440_v40  ;;  %v1592_v33 = vld [vmem:[%s1389_s25 + $0x1c8] sm:$0xff]  ;;  %v1595_v34 = vld [vmem:[%s1389_s25 + $0x1d0] sm:$0xff] }
  0xb1   : > { %728 = vst [vmem:[%s1454_s21 + $0x68] sm:$0xff] %v472_v52  ;;  %729 = vst [vmem:[%s1454_s21 + $0x70] sm:$0xff] %v473_v53  ;;  %v489_v22 = vmul.f32 %v1414_v18, %v1443_v41  ;;  %v490_v23 = vmul.f32 %v1414_v18, %v1446_v42  ;;  %v491_v28 = vmul.f32 %v1414_v18, %v1461_v47  ;;  %v1598_v35 = vld [vmem:[%s1389_s25 + $0x1d8] sm:$0xff]  ;;  %v1613_v40 = vld [vmem:[%s1389_s25 + $0x1e0] sm:$0xff] }
  0xb2   : > { %730 = vst [vmem:[%s1454_s21 + $0x78] sm:$0xff] %v474_v54  ;;  %731 = vst [vmem:[%s1454_s21 + $0x80] sm:$0xff] %v475_v59  ;;  %v492_v29 = vmul.f32 %v1414_v18, %v1464_v48  ;;  %v493_v30 = vmul.f32 %v1414_v18, %v1467_v49  ;;  %v494_v31 = vmul.f32 %v1414_v18, %v1470_v50  ;;  %v1616_v41 = vld [vmem:[%s1389_s25 + $0x1e8] sm:$0xff]  ;;  %v1619_v42 = vld [vmem:[%s1389_s25 + $0x1f0] sm:$0xff] }
  0xb3   : > { %732 = vst [vmem:[%s1454_s21 + $0x88] sm:$0xff] %v476_v60  ;;  %733 = vst [vmem:[%s1454_s21 + $0x90] sm:$0xff] %v477_v61  ;;  %v495_v36 = vmul.f32 %v1414_v18, %v1481_v55  ;;  %v496_v37 = vmul.f32 %v1414_v18, %v1484_v56  ;;  %v497_v38 = vmul.f32 %v1414_v18, %v1487_v57  ;;  %v1622_v43 = vld [vmem:[%s1389_s25 + $0x1f8] sm:$0xff]  ;;  %v1637_v48 = vld [vmem:[%s1389_s25 + $0x200] sm:$0xff] }
  0xb4   : > { %734 = vst [vmem:[%s1454_s21 + $0x98] sm:$0xff] %v478_v62  ;;  %735 = vst [vmem:[%s1454_s21 + $0xa0] sm:$0xff] %v479_v3  ;;  %v498_v39 = vmul.f32 %v1414_v18, %v1490_v58  ;;  %v499_v44 = vmul.f32 %v1414_v18, %v1501_v63  ;;  %v500_v45 = vmul.f32 %v1414_v18, %v1504_v0  ;;  %v1640_v49 = vld [vmem:[%s1389_s25 + $0x208] sm:$0xff]  ;;  %v1643_v50 = vld [vmem:[%s1389_s25 + $0x210] sm:$0xff] }
  0xb5   : > { %736 = vst [vmem:[%s1454_s21 + $0xa8] sm:$0xff] %v480_v4  ;;  %737 = vst [vmem:[%s1454_s21 + $0xb0] sm:$0xff] %v481_v5  ;;  %v501_v46 = vmul.f32 %v1414_v18, %v1507_v1  ;;  %v502_v47 = vmul.f32 %v1414_v18, %v1510_v2  ;;  %v1646_v51 = vld [vmem:[%s1389_s25 + $0x218] sm:$0xff]  ;;  %v503_v52 = vmul.f32 %v1414_v18, %v1521_v7  ;;  %v1661_v56 = vld [vmem:[%s1389_s25 + $0x220] sm:$0xff] }
  0xb6   : > { %738 = vst [vmem:[%s1454_s21 + $0xb8] sm:$0xff] %v482_v6  ;;  %739 = vst [vmem:[%s1454_s21 + $0xc0] sm:$0xff] %v483_v11  ;;  %v504_v53 = vmul.f32 %v1414_v18, %v1524_v8  ;;  %v505_v54 = vmul.f32 %v1414_v18, %v1527_v9  ;;  %v506_v55 = vmul.f32 %v1414_v18, %v1530_v10  ;;  %v1664_v57 = vld [vmem:[%s1389_s25 + $0x228] sm:$0xff]  ;;  %v1667_v58 = vld [vmem:[%s1389_s25 + $0x230] sm:$0xff] }
  0xb7   : > { %740 = vst [vmem:[%s1454_s21 + $0xc8] sm:$0xff] %v484_v12  ;;  %741 = vst [vmem:[%s1454_s21 + $0xd0] sm:$0xff] %v485_v13  ;;  %v1670_v59 = vld [vmem:[%s1389_s25 + $0x238] sm:$0xff]  ;;  %v507_v60 = vmul.f32 %v1414_v18, %v1541_v15  ;;  %v508_v61 = vmul.f32 %v1414_v18, %v1544_v16  ;;  %v509_v62 = vmul.f32 %v1414_v18, %v1547_v17  ;;  %v1685_v0 = vld [vmem:[%s1389_s25 + $0x240] sm:$0xff] }
  0xb8   : > { %742 = vst [vmem:[%s1454_s21 + $0xd8] sm:$0xff] %v486_v14  ;;  %743 = vst [vmem:[%s1454_s21 + $0xe0] sm:$0xff] %v487_v20  ;;  %v510_v63 = vmul.f32 %v1414_v18, %v1550_v19  ;;  %v1688_v1 = vld [vmem:[%s1389_s25 + $0x248] sm:$0xff]  ;;  %v1691_v2 = vld [vmem:[%s1389_s25 + $0x250] sm:$0xff]  ;;  %v511_v4 = vmul.f32 %v1414_v18, %v1565_v24  ;;  %v512_v5 = vmul.f32 %v1414_v18, %v1568_v25 }
  0xb9   : > { %744 = vst [vmem:[%s1454_s21 + $0xe8] sm:$0xff] %v488_v21  ;;  %745 = vst [vmem:[%s1454_s21 + $0xf0] sm:$0xff] %v489_v22  ;;  %v1694_v3 = vld [vmem:[%s1389_s25 + $0x258] sm:$0xff]  ;;  %v513_v6 = vmul.f32 %v1414_v18, %v1571_v26  ;;  %v514_v7 = vmul.f32 %v1414_v18, %v1574_v27  ;;  %v1709_v8 = vld [vmem:[%s1389_s25 + $0x260] sm:$0xff]  ;;  %v515_v12 = vmul.f32 %v1414_v18, %v1589_v32 }
  0xba   : > { %746 = vst [vmem:[%s1454_s21 + $0xf8] sm:$0xff] %v490_v23  ;;  %747 = vst [vmem:[%s1454_s21 + $0x100] sm:$0xff] %v491_v28  ;;  %v1712_v9 = vld [vmem:[%s1389_s25 + $0x268] sm:$0xff]  ;;  %v1715_v10 = vld [vmem:[%s1389_s25 + $0x270] sm:$0xff]  ;;  %v516_v13 = vmul.f32 %v1414_v18, %v1592_v33  ;;  %v517_v14 = vmul.f32 %v1414_v18, %v1595_v34  ;;  %v518_v15 = vmul.f32 %v1414_v18, %v1598_v35 }
  0xbb   : > { %748 = vst [vmem:[%s1454_s21 + $0x108] sm:$0xff] %v492_v29  ;;  %749 = vst [vmem:[%s1454_s21 + $0x110] sm:$0xff] %v493_v30  ;;  %v1718_v11 = vld [vmem:[%s1389_s25 + $0x278] sm:$0xff]  ;;  %v1733_v16 = vld [vmem:[%s1389_s25 + $0x280] sm:$0xff]  ;;  %v519_v21 = vmul.f32 %v1414_v18, %v1613_v40  ;;  %v520_v22 = vmul.f32 %v1414_v18, %v1616_v41  ;;  %v521_v23 = vmul.f32 %v1414_v18, %v1619_v42 }
  0xbc   : > { %750 = vst [vmem:[%s1454_s21 + $0x118] sm:$0xff] %v494_v31  ;;  %751 = vst [vmem:[%s1454_s21 + $0x120] sm:$0xff] %v495_v36  ;;  %v1736_v17 = vld [vmem:[%s1389_s25 + $0x288] sm:$0xff]  ;;  %v1739_v19 = vld [vmem:[%s1389_s25 + $0x290] sm:$0xff]  ;;  %v522_v24 = vmul.f32 %v1414_v18, %v1622_v43  ;;  %v523_v29 = vmul.f32 %v1414_v18, %v1637_v48  ;;  %v524_v30 = vmul.f32 %v1414_v18, %v1640_v49 }
  0xbd   : > { %752 = vst [vmem:[%s1454_s21 + $0x128] sm:$0xff] %v496_v37  ;;  %753 = vst [vmem:[%s1454_s21 + $0x130] sm:$0xff] %v497_v38  ;;  %v1742_v20 = vld [vmem:[%s1389_s25 + $0x298] sm:$0xff]  ;;  %v1757_v25 = vld [vmem:[%s1389_s25 + $0x2a0] sm:$0xff]  ;;  %v525_v31 = vmul.f32 %v1414_v18, %v1643_v50  ;;  %v526_v32 = vmul.f32 %v1414_v18, %v1646_v51  ;;  %v527_v37 = vmul.f32 %v1414_v18, %v1661_v56 }
  0xbe   : > { %754 = vst [vmem:[%s1454_s21 + $0x138] sm:$0xff] %v498_v39  ;;  %755 = vst [vmem:[%s1454_s21 + $0x140] sm:$0xff] %v499_v44  ;;  %v1760_v26 = vld [vmem:[%s1389_s25 + $0x2a8] sm:$0xff]  ;;  %v1763_v27 = vld [vmem:[%s1389_s25 + $0x2b0] sm:$0xff]  ;;  %v528_v38 = vmul.f32 %v1414_v18, %v1664_v57  ;;  %v529_v39 = vmul.f32 %v1414_v18, %v1667_v58  ;;  %v530_v40 = vmul.f32 %v1414_v18, %v1670_v59 }
  0xbf   : > { %756 = vst [vmem:[%s1454_s21 + $0x148] sm:$0xff] %v500_v45  ;;  %757 = vst [vmem:[%s1454_s21 + $0x150] sm:$0xff] %v501_v46  ;;  %v1766_v28 = vld [vmem:[%s1389_s25 + $0x2b8] sm:$0xff]  ;;  %v1781_v33 = vld [vmem:[%s1389_s25 + $0x2c0] sm:$0xff]  ;;  %v531_v45 = vmul.f32 %v1414_v18, %v1685_v0  ;;  %v532_v46 = vmul.f32 %v1414_v18, %v1688_v1  ;;  %v534_v48 = vmul.f32 %v1414_v18, %v1694_v3 }
  0xc0   : > { %758 = vst [vmem:[%s1454_s21 + $0x158] sm:$0xff] %v502_v47  ;;  %759 = vst [vmem:[%s1454_s21 + $0x160] sm:$0xff] %v503_v52  ;;  %v1784_v34 = vld [vmem:[%s1389_s25 + $0x2c8] sm:$0xff]  ;;  %v1787_v35 = vld [vmem:[%s1389_s25 + $0x2d0] sm:$0xff]  ;;  %v533_v47 = vmul.f32 %v1414_v18, %v1691_v2  ;;  %v538_v56 = vmul.f32 %v1414_v18, %v1718_v11  ;;  %v542_v0 = vmul.f32 %v1414_v18, %v1742_v20 }
  0xc1   : > { %760 = vst [vmem:[%s1454_s21 + $0x168] sm:$0xff] %v504_v53  ;;  %761 = vst [vmem:[%s1454_s21 + $0x170] sm:$0xff] %v505_v54  ;;  %v1790_v36 = vld [vmem:[%s1389_s25 + $0x2d8] sm:$0xff]  ;;  %v1805_v41 = vld [vmem:[%s1389_s25 + $0x2e0] sm:$0xff]  ;;  %v535_v53 = vmul.f32 %v1414_v18, %v1709_v8  ;;  %v536_v54 = vmul.f32 %v1414_v18, %v1712_v9  ;;  %v546_v8 = vmul.f32 %v1414_v18, %v1766_v28 }
  0xc2   : > { %762 = vst [vmem:[%s1454_s21 + $0x178] sm:$0xff] %v506_v55  ;;  %763 = vst [vmem:[%s1454_s21 + $0x180] sm:$0xff] %v507_v60  ;;  %v1808_v42 = vld [vmem:[%s1389_s25 + $0x2e8] sm:$0xff]  ;;  %v1811_v43 = vld [vmem:[%s1389_s25 + $0x2f0] sm:$0xff]  ;;  %v537_v55 = vmul.f32 %v1414_v18, %v1715_v10 }
  0xc3   : > { %764 = vst [vmem:[%s1454_s21 + $0x188] sm:$0xff] %v508_v61  ;;  %765 = vst [vmem:[%s1454_s21 + $0x190] sm:$0xff] %v509_v62  ;;  %v1814_v44 = vld [vmem:[%s1389_s25 + $0x2f8] sm:$0xff]  ;;  %v1829_v49 = vld [vmem:[%s1389_s25 + $0x300] sm:$0xff]  ;;  %v539_v61 = vmul.f32 %v1414_v18, %v1733_v16  ;;  %v540_v62 = vmul.f32 %v1414_v18, %v1736_v17  ;;  %v550_v16 = vmul.f32 %v1414_v18, %v1790_v36 }
  0xc4   : > { %766 = vst [vmem:[%s1454_s21 + $0x198] sm:$0xff] %v510_v63  ;;  %767 = vst [vmem:[%s1454_s21 + $0x1a0] sm:$0xff] %v511_v4  ;;  %v1832_v50 = vld [vmem:[%s1389_s25 + $0x308] sm:$0xff]  ;;  %v1835_v51 = vld [vmem:[%s1389_s25 + $0x310] sm:$0xff]  ;;  %v541_v63 = vmul.f32 %v1414_v18, %v1739_v19 }
  0xc5   : > { %768 = vst [vmem:[%s1454_s21 + $0x1a8] sm:$0xff] %v512_v5  ;;  %769 = vst [vmem:[%s1454_s21 + $0x1b0] sm:$0xff] %v513_v6  ;;  %v1838_v52 = vld [vmem:[%s1389_s25 + $0x318] sm:$0xff]  ;;  %v1853_v57 = vld [vmem:[%s1389_s25 + $0x320] sm:$0xff]  ;;  %v543_v5 = vmul.f32 %v1414_v18, %v1757_v25  ;;  %v544_v6 = vmul.f32 %v1414_v18, %v1760_v26  ;;  %v554_v25 = vmul.f32 %v1414_v18, %v1814_v44 }
  0xc6   : > { %770 = vst [vmem:[%s1454_s21 + $0x1b8] sm:$0xff] %v514_v7  ;;  %771 = vst [vmem:[%s1454_s21 + $0x1c0] sm:$0xff] %v515_v12  ;;  %v1856_v58 = vld [vmem:[%s1389_s25 + $0x328] sm:$0xff]  ;;  %v1859_v59 = vld [vmem:[%s1389_s25 + $0x330] sm:$0xff]  ;;  %v545_v7 = vmul.f32 %v1414_v18, %v1763_v27 }
  0xc7   : > { %772 = vst [vmem:[%s1454_s21 + $0x1c8] sm:$0xff] %v516_v13  ;;  %773 = vst [vmem:[%s1454_s21 + $0x1d0] sm:$0xff] %v517_v14  ;;  %v1862_v60 = vld [vmem:[%s1389_s25 + $0x338] sm:$0xff]  ;;  %v1877_v1 = vld [vmem:[%s1389_s25 + $0x340] sm:$0xff]  ;;  %v547_v13 = vmul.f32 %v1414_v18, %v1781_v33  ;;  %v548_v14 = vmul.f32 %v1414_v18, %v1784_v34  ;;  %v558_v33 = vmul.f32 %v1414_v18, %v1838_v52 }
  0xc8   : > { %774 = vst [vmem:[%s1454_s21 + $0x1d8] sm:$0xff] %v518_v15  ;;  %775 = vst [vmem:[%s1454_s21 + $0x1e0] sm:$0xff] %v519_v21  ;;  %v1880_v2 = vld [vmem:[%s1389_s25 + $0x348] sm:$0xff]  ;;  %v1883_v3 = vld [vmem:[%s1389_s25 + $0x350] sm:$0xff]  ;;  %v549_v15 = vmul.f32 %v1414_v18, %v1787_v35 }
  0xc9   : > { %776 = vst [vmem:[%s1454_s21 + $0x1e8] sm:$0xff] %v520_v22  ;;  %777 = vst [vmem:[%s1454_s21 + $0x1f0] sm:$0xff] %v521_v23  ;;  %v1886_v4 = vld [vmem:[%s1389_s25 + $0x358] sm:$0xff]  ;;  %v1901_v9 = vld [vmem:[%s1389_s25 + $0x360] sm:$0xff]  ;;  %v551_v22 = vmul.f32 %v1414_v18, %v1805_v41  ;;  %v552_v23 = vmul.f32 %v1414_v18, %v1808_v42  ;;  %v562_v41 = vmul.f32 %v1414_v18, %v1862_v60 }
  0xca   : > { %778 = vst [vmem:[%s1454_s21 + $0x1f8] sm:$0xff] %v522_v24  ;;  %779 = vst [vmem:[%s1454_s21 + $0x200] sm:$0xff] %v523_v29  ;;  %v1904_v10 = vld [vmem:[%s1389_s25 + $0x368] sm:$0xff]  ;;  %v1907_v11 = vld [vmem:[%s1389_s25 + $0x370] sm:$0xff]  ;;  %v553_v24 = vmul.f32 %v1414_v18, %v1811_v43 }
  0xcb   : > { %780 = vst [vmem:[%s1454_s21 + $0x208] sm:$0xff] %v524_v30  ;;  %781 = vst [vmem:[%s1454_s21 + $0x210] sm:$0xff] %v525_v31  ;;  %v1910_v12 = vld [vmem:[%s1389_s25 + $0x378] sm:$0xff]  ;;  %v1925_v17 = vld [vmem:[%s1389_s25 + $0x380] sm:$0xff]  ;;  %v555_v30 = vmul.f32 %v1414_v18, %v1829_v49  ;;  %v556_v31 = vmul.f32 %v1414_v18, %v1832_v50  ;;  %v566_v49 = vmul.f32 %v1414_v18, %v1886_v4 }
  0xcc   : > { %782 = vst [vmem:[%s1454_s21 + $0x218] sm:$0xff] %v526_v32  ;;  %783 = vst [vmem:[%s1454_s21 + $0x220] sm:$0xff] %v527_v37  ;;  %v1928_v19 = vld [vmem:[%s1389_s25 + $0x388] sm:$0xff]  ;;  %v1931_v20 = vld [vmem:[%s1389_s25 + $0x390] sm:$0xff]  ;;  %v557_v32 = vmul.f32 %v1414_v18, %v1835_v51 }
  0xcd   : > { %784 = vst [vmem:[%s1454_s21 + $0x228] sm:$0xff] %v528_v38  ;;  %785 = vst [vmem:[%s1454_s21 + $0x230] sm:$0xff] %v529_v39  ;;  %v1934_v21 = vld [vmem:[%s1389_s25 + $0x398] sm:$0xff]  ;;  %v1949_v26 = vld [vmem:[%s1389_s25 + $0x3a0] sm:$0xff]  ;;  %v559_v38 = vmul.f32 %v1414_v18, %v1853_v57  ;;  %v560_v39 = vmul.f32 %v1414_v18, %v1856_v58  ;;  %v570_v57 = vmul.f32 %v1414_v18, %v1910_v12 }
  0xce   : > { %786 = vst [vmem:[%s1454_s21 + $0x238] sm:$0xff] %v530_v40  ;;  %787 = vst [vmem:[%s1454_s21 + $0x240] sm:$0xff] %v531_v45  ;;  %v1952_v27 = vld [vmem:[%s1389_s25 + $0x3a8] sm:$0xff]  ;;  %v1955_v28 = vld [vmem:[%s1389_s25 + $0x3b0] sm:$0xff]  ;;  %v561_v40 = vmul.f32 %v1414_v18, %v1859_v59 }
  0xcf   : > { %788 = vst [vmem:[%s1454_s21 + $0x248] sm:$0xff] %v532_v46  ;;  %789 = vst [vmem:[%s1454_s21 + $0x250] sm:$0xff] %v533_v47  ;;  %v1958_v29 = vld [vmem:[%s1389_s25 + $0x3b8] sm:$0xff]  ;;  %v1973_v34 = vld [vmem:[%s1389_s25 + $0x3c0] sm:$0xff]  ;;  %v563_v46 = vmul.f32 %v1414_v18, %v1877_v1  ;;  %v564_v47 = vmul.f32 %v1414_v18, %v1880_v2  ;;  %v574_v1 = vmul.f32 %v1414_v18, %v1934_v21 }
  0xd0   : > { %790 = vst [vmem:[%s1454_s21 + $0x258] sm:$0xff] %v534_v48  ;;  %791 = vst [vmem:[%s1454_s21 + $0x260] sm:$0xff] %v535_v53  ;;  %v1976_v35 = vld [vmem:[%s1389_s25 + $0x3c8] sm:$0xff]  ;;  %v1979_v36 = vld [vmem:[%s1389_s25 + $0x3d0] sm:$0xff]  ;;  %v565_v48 = vmul.f32 %v1414_v18, %v1883_v3 }
  0xd1   : > { %792 = vst [vmem:[%s1454_s21 + $0x268] sm:$0xff] %v536_v54  ;;  %793 = vst [vmem:[%s1454_s21 + $0x270] sm:$0xff] %v537_v55  ;;  %v1982_v37 = vld [vmem:[%s1389_s25 + $0x3d8] sm:$0xff]  ;;  %v1997_v42 = vld [vmem:[%s1389_s25 + $0x3e0] sm:$0xff]  ;;  %v567_v54 = vmul.f32 %v1414_v18, %v1901_v9  ;;  %v568_v55 = vmul.f32 %v1414_v18, %v1904_v10  ;;  %v578_v9 = vmul.f32 %v1414_v18, %v1958_v29 }
  0xd2   : > { %794 = vst [vmem:[%s1454_s21 + $0x278] sm:$0xff] %v538_v56  ;;  %795 = vst [vmem:[%s1454_s21 + $0x280] sm:$0xff] %v539_v61  ;;  %v2000_v43 = vld [vmem:[%s1389_s25 + $0x3e8] sm:$0xff]  ;;  %v2003_v44 = vld [vmem:[%s1389_s25 + $0x3f0] sm:$0xff]  ;;  %v569_v56 = vmul.f32 %v1414_v18, %v1907_v11 }
  0xd3   : > { %796 = vst [vmem:[%s1454_s21 + $0x288] sm:$0xff] %v540_v62  ;;  %797 = vst [vmem:[%s1454_s21 + $0x290] sm:$0xff] %v541_v63  ;;  %v2006_v45 = vld [vmem:[%s1389_s25 + $0x3f8] sm:$0xff]  ;;  %v2021_v50 = vld [vmem:[%s1389_s25 + $0x400] sm:$0xff]  ;;  %v571_v62 = vmul.f32 %v1414_v18, %v1925_v17  ;;  %v572_v63 = vmul.f32 %v1414_v18, %v1928_v19  ;;  %v582_v17 = vmul.f32 %v1414_v18, %v1982_v37 }
  0xd4   : > { %798 = vst [vmem:[%s1454_s21 + $0x298] sm:$0xff] %v542_v0  ;;  %799 = vst [vmem:[%s1454_s21 + $0x2a0] sm:$0xff] %v543_v5  ;;  %v2024_v51 = vld [vmem:[%s1389_s25 + $0x408] sm:$0xff]  ;;  %v2027_v52 = vld [vmem:[%s1389_s25 + $0x410] sm:$0xff]  ;;  %v573_v0 = vmul.f32 %v1414_v18, %v1931_v20 }
  0xd5   : > { %800 = vst [vmem:[%s1454_s21 + $0x2a8] sm:$0xff] %v544_v6  ;;  %801 = vst [vmem:[%s1454_s21 + $0x2b0] sm:$0xff] %v545_v7  ;;  %v2030_v53 = vld [vmem:[%s1389_s25 + $0x418] sm:$0xff]  ;;  %v2045_v58 = vld [vmem:[%s1389_s25 + $0x420] sm:$0xff]  ;;  %v575_v6 = vmul.f32 %v1414_v18, %v1949_v26  ;;  %v576_v7 = vmul.f32 %v1414_v18, %v1952_v27  ;;  %v586_v26 = vmul.f32 %v1414_v18, %v2006_v45 }
  0xd6   : > { %802 = vst [vmem:[%s1454_s21 + $0x2b8] sm:$0xff] %v546_v8  ;;  %803 = vst [vmem:[%s1454_s21 + $0x2c0] sm:$0xff] %v547_v13  ;;  %v2048_v59 = vld [vmem:[%s1389_s25 + $0x428] sm:$0xff]  ;;  %v2051_v60 = vld [vmem:[%s1389_s25 + $0x430] sm:$0xff]  ;;  %v577_v8 = vmul.f32 %v1414_v18, %v1955_v28 }
  0xd7   : > { %804 = vst [vmem:[%s1454_s21 + $0x2c8] sm:$0xff] %v548_v14  ;;  %805 = vst [vmem:[%s1454_s21 + $0x2d0] sm:$0xff] %v549_v15  ;;  %v2054_v61 = vld [vmem:[%s1389_s25 + $0x438] sm:$0xff]  ;;  %v2069_v2 = vld [vmem:[%s1389_s25 + $0x440] sm:$0xff]  ;;  %v579_v14 = vmul.f32 %v1414_v18, %v1973_v34  ;;  %v580_v15 = vmul.f32 %v1414_v18, %v1976_v35  ;;  %v590_v34 = vmul.f32 %v1414_v18, %v2030_v53 }
  0xd8   : > { %806 = vst [vmem:[%s1454_s21 + $0x2d8] sm:$0xff] %v550_v16  ;;  %807 = vst [vmem:[%s1454_s21 + $0x2e0] sm:$0xff] %v551_v22  ;;  %v2072_v3 = vld [vmem:[%s1389_s25 + $0x448] sm:$0xff]  ;;  %v2075_v4 = vld [vmem:[%s1389_s25 + $0x450] sm:$0xff]  ;;  %v581_v16 = vmul.f32 %v1414_v18, %v1979_v36 }
  0xd9   : > { %808 = vst [vmem:[%s1454_s21 + $0x2e8] sm:$0xff] %v552_v23  ;;  %809 = vst [vmem:[%s1454_s21 + $0x2f0] sm:$0xff] %v553_v24  ;;  %v2078_v5 = vld [vmem:[%s1389_s25 + $0x458] sm:$0xff]  ;;  %v2093_v10 = vld [vmem:[%s1389_s25 + $0x460] sm:$0xff]  ;;  %v583_v23 = vmul.f32 %v1414_v18, %v1997_v42  ;;  %v584_v24 = vmul.f32 %v1414_v18, %v2000_v43  ;;  %v594_v42 = vmul.f32 %v1414_v18, %v2054_v61 }
  0xda   : > { %810 = vst [vmem:[%s1454_s21 + $0x2f8] sm:$0xff] %v554_v25  ;;  %811 = vst [vmem:[%s1454_s21 + $0x300] sm:$0xff] %v555_v30  ;;  %v2096_v11 = vld [vmem:[%s1389_s25 + $0x468] sm:$0xff]  ;;  %v2099_v12 = vld [vmem:[%s1389_s25 + $0x470] sm:$0xff]  ;;  %v585_v25 = vmul.f32 %v1414_v18, %v2003_v44 }
  0xdb   : > { %812 = vst [vmem:[%s1454_s21 + $0x308] sm:$0xff] %v556_v31  ;;  %813 = vst [vmem:[%s1454_s21 + $0x310] sm:$0xff] %v557_v32  ;;  %v2102_v13 = vld [vmem:[%s1389_s25 + $0x478] sm:$0xff]  ;;  %v2117_v19 = vld [vmem:[%s1389_s25 + $0x480] sm:$0xff]  ;;  %v587_v31 = vmul.f32 %v1414_v18, %v2021_v50  ;;  %v588_v32 = vmul.f32 %v1414_v18, %v2024_v51  ;;  %v598_v50 = vmul.f32 %v1414_v18, %v2078_v5 }
  0xdc   : > { %814 = vst [vmem:[%s1454_s21 + $0x318] sm:$0xff] %v558_v33  ;;  %815 = vst [vmem:[%s1454_s21 + $0x320] sm:$0xff] %v559_v38  ;;  %v2120_v20 = vld [vmem:[%s1389_s25 + $0x488] sm:$0xff]  ;;  %v2123_v21 = vld [vmem:[%s1389_s25 + $0x490] sm:$0xff]  ;;  %v589_v33 = vmul.f32 %v1414_v18, %v2027_v52 }
  0xdd   : > { %816 = vst [vmem:[%s1454_s21 + $0x328] sm:$0xff] %v560_v39  ;;  %817 = vst [vmem:[%s1454_s21 + $0x330] sm:$0xff] %v561_v40  ;;  %v2126_v22 = vld [vmem:[%s1389_s25 + $0x498] sm:$0xff]  ;;  %v2141_v27 = vld [vmem:[%s1389_s25 + $0x4a0] sm:$0xff]  ;;  %v591_v39 = vmul.f32 %v1414_v18, %v2045_v58  ;;  %v592_v40 = vmul.f32 %v1414_v18, %v2048_v59  ;;  %v602_v58 = vmul.f32 %v1414_v18, %v2102_v13 }
  0xde   : > { %818 = vst [vmem:[%s1454_s21 + $0x338] sm:$0xff] %v562_v41  ;;  %819 = vst [vmem:[%s1454_s21 + $0x340] sm:$0xff] %v563_v46  ;;  %v2144_v28 = vld [vmem:[%s1389_s25 + $0x4a8] sm:$0xff]  ;;  %v2147_v29 = vld [vmem:[%s1389_s25 + $0x4b0] sm:$0xff]  ;;  %v593_v41 = vmul.f32 %v1414_v18, %v2051_v60 }
  0xdf   : > { %820 = vst [vmem:[%s1454_s21 + $0x348] sm:$0xff] %v564_v47  ;;  %821 = vst [vmem:[%s1454_s21 + $0x350] sm:$0xff] %v565_v48  ;;  %v2150_v30 = vld [vmem:[%s1389_s25 + $0x4b8] sm:$0xff]  ;;  %v2165_v35 = vld [vmem:[%s1389_s25 + $0x4c0] sm:$0xff]  ;;  %v595_v47 = vmul.f32 %v1414_v18, %v2069_v2  ;;  %v596_v48 = vmul.f32 %v1414_v18, %v2072_v3  ;;  %v606_v2 = vmul.f32 %v1414_v18, %v2126_v22 }
  0xe0   : > { %822 = vst [vmem:[%s1454_s21 + $0x358] sm:$0xff] %v566_v49  ;;  %823 = vst [vmem:[%s1454_s21 + $0x360] sm:$0xff] %v567_v54  ;;  %v2168_v36 = vld [vmem:[%s1389_s25 + $0x4c8] sm:$0xff]  ;;  %v2171_v37 = vld [vmem:[%s1389_s25 + $0x4d0] sm:$0xff]  ;;  %v597_v49 = vmul.f32 %v1414_v18, %v2075_v4 }
  0xe1   : > { %824 = vst [vmem:[%s1454_s21 + $0x368] sm:$0xff] %v568_v55  ;;  %825 = vst [vmem:[%s1454_s21 + $0x370] sm:$0xff] %v569_v56  ;;  %v2174_v38 = vld [vmem:[%s1389_s25 + $0x4d8] sm:$0xff]  ;;  %v2189_v43 = vld [vmem:[%s1389_s25 + $0x4e0] sm:$0xff]  ;;  %v599_v55 = vmul.f32 %v1414_v18, %v2093_v10  ;;  %v600_v56 = vmul.f32 %v1414_v18, %v2096_v11  ;;  %v610_v10 = vmul.f32 %v1414_v18, %v2150_v30 }
  0xe2   : > { %826 = vst [vmem:[%s1454_s21 + $0x378] sm:$0xff] %v570_v57  ;;  %827 = vst [vmem:[%s1454_s21 + $0x380] sm:$0xff] %v571_v62  ;;  %v2192_v44 = vld [vmem:[%s1389_s25 + $0x4e8] sm:$0xff]  ;;  %v2195_v45 = vld [vmem:[%s1389_s25 + $0x4f0] sm:$0xff]  ;;  %v601_v57 = vmul.f32 %v1414_v18, %v2099_v12 }
  0xe3   : > { %828 = vst [vmem:[%s1454_s21 + $0x388] sm:$0xff] %v572_v63  ;;  %829 = vst [vmem:[%s1454_s21 + $0x390] sm:$0xff] %v573_v0  ;;  %v2198_v46 = vld [vmem:[%s1389_s25 + $0x4f8] sm:$0xff]  ;;  %v2213_v51 = vld [vmem:[%s1389_s25 + $0x500] sm:$0xff]  ;;  %v603_v63 = vmul.f32 %v1414_v18, %v2117_v19  ;;  %v604_v0 = vmul.f32 %v1414_v18, %v2120_v20  ;;  %v614_v19 = vmul.f32 %v1414_v18, %v2174_v38 }
  0xe4   : > { %830 = vst [vmem:[%s1454_s21 + $0x398] sm:$0xff] %v574_v1  ;;  %831 = vst [vmem:[%s1454_s21 + $0x3a0] sm:$0xff] %v575_v6  ;;  %v2216_v52 = vld [vmem:[%s1389_s25 + $0x508] sm:$0xff]  ;;  %v2219_v53 = vld [vmem:[%s1389_s25 + $0x510] sm:$0xff]  ;;  %v605_v1 = vmul.f32 %v1414_v18, %v2123_v21 }
  0xe5   : > { %832 = vst [vmem:[%s1454_s21 + $0x3a8] sm:$0xff] %v576_v7  ;;  %833 = vst [vmem:[%s1454_s21 + $0x3b0] sm:$0xff] %v577_v8  ;;  %v2222_v54 = vld [vmem:[%s1389_s25 + $0x518] sm:$0xff]  ;;  %v2237_v59 = vld [vmem:[%s1389_s25 + $0x520] sm:$0xff]  ;;  %v607_v7 = vmul.f32 %v1414_v18, %v2141_v27  ;;  %v608_v8 = vmul.f32 %v1414_v18, %v2144_v28  ;;  %v618_v27 = vmul.f32 %v1414_v18, %v2198_v46 }
  0xe6   : > { %834 = vst [vmem:[%s1454_s21 + $0x3b8] sm:$0xff] %v578_v9  ;;  %835 = vst [vmem:[%s1454_s21 + $0x3c0] sm:$0xff] %v579_v14  ;;  %v2240_v60 = vld [vmem:[%s1389_s25 + $0x528] sm:$0xff]  ;;  %v2243_v61 = vld [vmem:[%s1389_s25 + $0x530] sm:$0xff]  ;;  %v609_v9 = vmul.f32 %v1414_v18, %v2147_v29 }
  0xe7   : > { %836 = vst [vmem:[%s1454_s21 + $0x3c8] sm:$0xff] %v580_v15  ;;  %837 = vst [vmem:[%s1454_s21 + $0x3d0] sm:$0xff] %v581_v16  ;;  %v2246_v62 = vld [vmem:[%s1389_s25 + $0x538] sm:$0xff]  ;;  %v2261_v3 = vld [vmem:[%s1389_s25 + $0x540] sm:$0xff]  ;;  %v611_v15 = vmul.f32 %v1414_v18, %v2165_v35  ;;  %v612_v16 = vmul.f32 %v1414_v18, %v2168_v36  ;;  %v622_v35 = vmul.f32 %v1414_v18, %v2222_v54 }
  0xe8   : > { %838 = vst [vmem:[%s1454_s21 + $0x3d8] sm:$0xff] %v582_v17  ;;  %839 = vst [vmem:[%s1454_s21 + $0x3e0] sm:$0xff] %v583_v23  ;;  %v2264_v4 = vld [vmem:[%s1389_s25 + $0x548] sm:$0xff]  ;;  %v2267_v5 = vld [vmem:[%s1389_s25 + $0x550] sm:$0xff]  ;;  %v613_v17 = vmul.f32 %v1414_v18, %v2171_v37 }
  0xe9   : > { %840 = vst [vmem:[%s1454_s21 + $0x3e8] sm:$0xff] %v584_v24  ;;  %841 = vst [vmem:[%s1454_s21 + $0x3f0] sm:$0xff] %v585_v25  ;;  %v2270_v6 = vld [vmem:[%s1389_s25 + $0x558] sm:$0xff]  ;;  %v2285_v11 = vld [vmem:[%s1389_s25 + $0x560] sm:$0xff]  ;;  %v615_v24 = vmul.f32 %v1414_v18, %v2189_v43  ;;  %v616_v25 = vmul.f32 %v1414_v18, %v2192_v44  ;;  %v626_v43 = vmul.f32 %v1414_v18, %v2246_v62 }
  0xea   : > { %842 = vst [vmem:[%s1454_s21 + $0x3f8] sm:$0xff] %v586_v26  ;;  %843 = vst [vmem:[%s1454_s21 + $0x400] sm:$0xff] %v587_v31  ;;  %v2288_v12 = vld [vmem:[%s1389_s25 + $0x568] sm:$0xff]  ;;  %v2291_v13 = vld [vmem:[%s1389_s25 + $0x570] sm:$0xff]  ;;  %v617_v26 = vmul.f32 %v1414_v18, %v2195_v45 }
  0xeb   : > { %844 = vst [vmem:[%s1454_s21 + $0x408] sm:$0xff] %v588_v32  ;;  %845 = vst [vmem:[%s1454_s21 + $0x410] sm:$0xff] %v589_v33  ;;  %v2294_v14 = vld [vmem:[%s1389_s25 + $0x578] sm:$0xff]  ;;  %v2309_v20 = vld [vmem:[%s1389_s25 + $0x580] sm:$0xff]  ;;  %v619_v32 = vmul.f32 %v1414_v18, %v2213_v51  ;;  %v620_v33 = vmul.f32 %v1414_v18, %v2216_v52  ;;  %v630_v51 = vmul.f32 %v1414_v18, %v2270_v6 }
  0xec   : > { %846 = vst [vmem:[%s1454_s21 + $0x418] sm:$0xff] %v590_v34  ;;  %847 = vst [vmem:[%s1454_s21 + $0x420] sm:$0xff] %v591_v39  ;;  %v2312_v21 = vld [vmem:[%s1389_s25 + $0x588] sm:$0xff]  ;;  %v2315_v22 = vld [vmem:[%s1389_s25 + $0x590] sm:$0xff]  ;;  %v621_v34 = vmul.f32 %v1414_v18, %v2219_v53 }
  0xed   : > { %848 = vst [vmem:[%s1454_s21 + $0x428] sm:$0xff] %v592_v40  ;;  %849 = vst [vmem:[%s1454_s21 + $0x430] sm:$0xff] %v593_v41  ;;  %v2318_v23 = vld [vmem:[%s1389_s25 + $0x598] sm:$0xff]  ;;  %v2333_v28 = vld [vmem:[%s1389_s25 + $0x5a0] sm:$0xff]  ;;  %v623_v40 = vmul.f32 %v1414_v18, %v2237_v59  ;;  %v624_v41 = vmul.f32 %v1414_v18, %v2240_v60  ;;  %v634_v59 = vmul.f32 %v1414_v18, %v2294_v14 }
  0xee   : > { %850 = vst [vmem:[%s1454_s21 + $0x438] sm:$0xff] %v594_v42  ;;  %851 = vst [vmem:[%s1454_s21 + $0x440] sm:$0xff] %v595_v47  ;;  %v2336_v29 = vld [vmem:[%s1389_s25 + $0x5a8] sm:$0xff]  ;;  %v2339_v30 = vld [vmem:[%s1389_s25 + $0x5b0] sm:$0xff]  ;;  %v625_v42 = vmul.f32 %v1414_v18, %v2243_v61 }
  0xef   : > { %852 = vst [vmem:[%s1454_s21 + $0x448] sm:$0xff] %v596_v48  ;;  %853 = vst [vmem:[%s1454_s21 + $0x450] sm:$0xff] %v597_v49  ;;  %v2342_v31 = vld [vmem:[%s1389_s25 + $0x5b8] sm:$0xff]  ;;  %v2357_v36 = vld [vmem:[%s1389_s25 + $0x5c0] sm:$0xff]  ;;  %v627_v48 = vmul.f32 %v1414_v18, %v2261_v3  ;;  %v628_v49 = vmul.f32 %v1414_v18, %v2264_v4  ;;  %v638_v3 = vmul.f32 %v1414_v18, %v2318_v23 }
  0xf0   : > { %854 = vst [vmem:[%s1454_s21 + $0x458] sm:$0xff] %v598_v50  ;;  %855 = vst [vmem:[%s1454_s21 + $0x460] sm:$0xff] %v599_v55  ;;  %v2360_v37 = vld [vmem:[%s1389_s25 + $0x5c8] sm:$0xff]  ;;  %v2363_v38 = vld [vmem:[%s1389_s25 + $0x5d0] sm:$0xff]  ;;  %v629_v50 = vmul.f32 %v1414_v18, %v2267_v5 }
  0xf1   : > { %856 = vst [vmem:[%s1454_s21 + $0x468] sm:$0xff] %v600_v56  ;;  %857 = vst [vmem:[%s1454_s21 + $0x470] sm:$0xff] %v601_v57  ;;  %v2366_v39 = vld [vmem:[%s1389_s25 + $0x5d8] sm:$0xff]  ;;  %v2381_v44 = vld [vmem:[%s1389_s25 + $0x5e0] sm:$0xff]  ;;  %v631_v56 = vmul.f32 %v1414_v18, %v2285_v11  ;;  %v632_v57 = vmul.f32 %v1414_v18, %v2288_v12  ;;  %v642_v11 = vmul.f32 %v1414_v18, %v2342_v31 }
  0xf2   : > { %858 = vst [vmem:[%s1454_s21 + $0x478] sm:$0xff] %v602_v58  ;;  %859 = vst [vmem:[%s1454_s21 + $0x480] sm:$0xff] %v603_v63  ;;  %v2384_v45 = vld [vmem:[%s1389_s25 + $0x5e8] sm:$0xff]  ;;  %v2387_v46 = vld [vmem:[%s1389_s25 + $0x5f0] sm:$0xff]  ;;  %v633_v58 = vmul.f32 %v1414_v18, %v2291_v13 }
  0xf3   : > { %860 = vst [vmem:[%s1454_s21 + $0x488] sm:$0xff] %v604_v0  ;;  %861 = vst [vmem:[%s1454_s21 + $0x490] sm:$0xff] %v605_v1  ;;  %v2390_v47 = vld [vmem:[%s1389_s25 + $0x5f8] sm:$0xff]  ;;  %v2405_v52 = vld [vmem:[%s1389_s25 + $0x600] sm:$0xff]  ;;  %v635_v0 = vmul.f32 %v1414_v18, %v2309_v20  ;;  %v636_v1 = vmul.f32 %v1414_v18, %v2312_v21  ;;  %v646_v20 = vmul.f32 %v1414_v18, %v2366_v39 }
  0xf4   : > { %862 = vst [vmem:[%s1454_s21 + $0x498] sm:$0xff] %v606_v2  ;;  %863 = vst [vmem:[%s1454_s21 + $0x4a0] sm:$0xff] %v607_v7  ;;  %v2408_v53 = vld [vmem:[%s1389_s25 + $0x608] sm:$0xff]  ;;  %v2411_v54 = vld [vmem:[%s1389_s25 + $0x610] sm:$0xff]  ;;  %v637_v2 = vmul.f32 %v1414_v18, %v2315_v22 }
  0xf5   : > { %864 = vst [vmem:[%s1454_s21 + $0x4a8] sm:$0xff] %v608_v8  ;;  %865 = vst [vmem:[%s1454_s21 + $0x4b0] sm:$0xff] %v609_v9  ;;  %v2414_v55 = vld [vmem:[%s1389_s25 + $0x618] sm:$0xff]  ;;  %v2429_v60 = vld [vmem:[%s1389_s25 + $0x620] sm:$0xff]  ;;  %v639_v8 = vmul.f32 %v1414_v18, %v2333_v28  ;;  %v640_v9 = vmul.f32 %v1414_v18, %v2336_v29  ;;  %v650_v28 = vmul.f32 %v1414_v18, %v2390_v47 }
  0xf6   : > { %866 = vst [vmem:[%s1454_s21 + $0x4b8] sm:$0xff] %v610_v10  ;;  %867 = vst [vmem:[%s1454_s21 + $0x4c0] sm:$0xff] %v611_v15  ;;  %v2432_v61 = vld [vmem:[%s1389_s25 + $0x628] sm:$0xff]  ;;  %v2435_v62 = vld [vmem:[%s1389_s25 + $0x630] sm:$0xff]  ;;  %v641_v10 = vmul.f32 %v1414_v18, %v2339_v30 }
  0xf7   : > { %868 = vst [vmem:[%s1454_s21 + $0x4c8] sm:$0xff] %v612_v16  ;;  %869 = vst [vmem:[%s1454_s21 + $0x4d0] sm:$0xff] %v613_v17  ;;  %v2438_v63 = vld [vmem:[%s1389_s25 + $0x638] sm:$0xff]  ;;  %v2453_v4 = vld [vmem:[%s1389_s25 + $0x640] sm:$0xff]  ;;  %v643_v16 = vmul.f32 %v1414_v18, %v2357_v36  ;;  %v644_v17 = vmul.f32 %v1414_v18, %v2360_v37  ;;  %v654_v36 = vmul.f32 %v1414_v18, %v2414_v55 }
  0xf8   : > { %870 = vst [vmem:[%s1454_s21 + $0x4d8] sm:$0xff] %v614_v19  ;;  %871 = vst [vmem:[%s1454_s21 + $0x4e0] sm:$0xff] %v615_v24  ;;  %v2456_v5 = vld [vmem:[%s1389_s25 + $0x648] sm:$0xff]  ;;  %v2459_v6 = vld [vmem:[%s1389_s25 + $0x650] sm:$0xff]  ;;  %v645_v19 = vmul.f32 %v1414_v18, %v2363_v38 }
  0xf9   : > { %872 = vst [vmem:[%s1454_s21 + $0x4e8] sm:$0xff] %v616_v25  ;;  %873 = vst [vmem:[%s1454_s21 + $0x4f0] sm:$0xff] %v617_v26  ;;  %v2462_v7 = vld [vmem:[%s1389_s25 + $0x658] sm:$0xff]  ;;  %v2477_v12 = vld [vmem:[%s1389_s25 + $0x660] sm:$0xff]  ;;  %v647_v25 = vmul.f32 %v1414_v18, %v2381_v44  ;;  %v648_v26 = vmul.f32 %v1414_v18, %v2384_v45  ;;  %v658_v44 = vmul.f32 %v1414_v18, %v2438_v63 }
  0xfa   : > { %874 = vst [vmem:[%s1454_s21 + $0x4f8] sm:$0xff] %v618_v27  ;;  %875 = vst [vmem:[%s1454_s21 + $0x500] sm:$0xff] %v619_v32  ;;  %v2480_v13 = vld [vmem:[%s1389_s25 + $0x668] sm:$0xff]  ;;  %v2483_v14 = vld [vmem:[%s1389_s25 + $0x670] sm:$0xff]  ;;  %v649_v27 = vmul.f32 %v1414_v18, %v2387_v46 }
  0xfb   : > { %876 = vst [vmem:[%s1454_s21 + $0x508] sm:$0xff] %v620_v33  ;;  %877 = vst [vmem:[%s1454_s21 + $0x510] sm:$0xff] %v621_v34  ;;  %v2486_v15 = vld [vmem:[%s1389_s25 + $0x678] sm:$0xff]  ;;  %v2501_v21 = vld [vmem:[%s1389_s25 + $0x680] sm:$0xff]  ;;  %v651_v33 = vmul.f32 %v1414_v18, %v2405_v52  ;;  %v652_v34 = vmul.f32 %v1414_v18, %v2408_v53  ;;  %v662_v52 = vmul.f32 %v1414_v18, %v2462_v7 }
  0xfc   : > { %878 = vst [vmem:[%s1454_s21 + $0x518] sm:$0xff] %v622_v35  ;;  %879 = vst [vmem:[%s1454_s21 + $0x520] sm:$0xff] %v623_v40  ;;  %v2504_v22 = vld [vmem:[%s1389_s25 + $0x688] sm:$0xff]  ;;  %v2507_v23 = vld [vmem:[%s1389_s25 + $0x690] sm:$0xff]  ;;  %v653_v35 = vmul.f32 %v1414_v18, %v2411_v54 }
  0xfd   : > { %880 = vst [vmem:[%s1454_s21 + $0x528] sm:$0xff] %v624_v41  ;;  %881 = vst [vmem:[%s1454_s21 + $0x530] sm:$0xff] %v625_v42  ;;  %v2510_v24 = vld [vmem:[%s1389_s25 + $0x698] sm:$0xff]  ;;  %v2525_v29 = vld [vmem:[%s1389_s25 + $0x6a0] sm:$0xff]  ;;  %v655_v41 = vmul.f32 %v1414_v18, %v2429_v60  ;;  %v656_v42 = vmul.f32 %v1414_v18, %v2432_v61  ;;  %v666_v60 = vmul.f32 %v1414_v18, %v2486_v15 }
  0xfe   : > { %882 = vst [vmem:[%s1454_s21 + $0x538] sm:$0xff] %v626_v43  ;;  %883 = vst [vmem:[%s1454_s21 + $0x540] sm:$0xff] %v627_v48  ;;  %v2528_v30 = vld [vmem:[%s1389_s25 + $0x6a8] sm:$0xff]  ;;  %v2531_v31 = vld [vmem:[%s1389_s25 + $0x6b0] sm:$0xff]  ;;  %v657_v43 = vmul.f32 %v1414_v18, %v2435_v62 }
  0xff   : > { %884 = vst [vmem:[%s1454_s21 + $0x548] sm:$0xff] %v628_v49  ;;  %885 = vst [vmem:[%s1454_s21 + $0x550] sm:$0xff] %v629_v50  ;;  %v2534_v32 = vld [vmem:[%s1389_s25 + $0x6b8] sm:$0xff]  ;;  %v413_v37 = vld [vmem:[%s1389_s25 + $0x6c0] sm:$0xff]  ;;  %v659_v49 = vmul.f32 %v1414_v18, %v2453_v4  ;;  %v660_v50 = vmul.f32 %v1414_v18, %v2456_v5  ;;  %v670_v4 = vmul.f32 %v1414_v18, %v2510_v24 }
 0x100   : > { %886 = vst [vmem:[%s1454_s21 + $0x558] sm:$0xff] %v630_v51  ;;  %887 = vst [vmem:[%s1454_s21 + $0x560] sm:$0xff] %v631_v56  ;;  %v414_v38 = vld [vmem:[%s1389_s25 + $0x6c8] sm:$0xff]  ;;  %v415_v39 = vld [vmem:[%s1389_s25 + $0x6d0] sm:$0xff]  ;;  %v661_v51 = vmul.f32 %v1414_v18, %v2459_v6  ;;  %v675_v15 = vmul.f32 %v1414_v18, %v413_v37 }
 0x101   : > { %888 = vst [vmem:[%s1454_s21 + $0x568] sm:$0xff] %v632_v57  ;;  %889 = vst [vmem:[%s1454_s21 + $0x570] sm:$0xff] %v633_v58  ;;  %v416_v40 = vld [vmem:[%s1389_s25 + $0x6d8] sm:$0xff]  ;;  %v417_v45 = vld [vmem:[%s1389_s25 + $0x6e0] sm:$0xff]  ;;  %v663_v57 = vmul.f32 %v1414_v18, %v2477_v12  ;;  %v664_v58 = vmul.f32 %v1414_v18, %v2480_v13 }
 0x102   : > { %890 = vst [vmem:[%s1454_s21 + $0x578] sm:$0xff] %v634_v59  ;;  %891 = vst [vmem:[%s1454_s21 + $0x580] sm:$0xff] %v635_v0  ;;  %v418_v46 = vld [vmem:[%s1389_s25 + $0x6e8] sm:$0xff]  ;;  %v419_v47 = vld [vmem:[%s1389_s25 + $0x6f0] sm:$0xff]  ;;  %v665_v59 = vmul.f32 %v1414_v18, %v2483_v14 }
 0x103   : > { %892 = vst [vmem:[%s1454_s21 + $0x588] sm:$0xff] %v636_v1  ;;  %893 = vst [vmem:[%s1454_s21 + $0x590] sm:$0xff] %v637_v2  ;;  %v420_v48 = vld [vmem:[%s1389_s25 + $0x6f8] sm:$0xff]  ;;  %v421_v53 = vld [vmem:[%s1389_s25 + $0x700] sm:$0xff]  ;;  %v667_v1 = vmul.f32 %v1414_v18, %v2501_v21  ;;  %v668_v2 = vmul.f32 %v1414_v18, %v2504_v22  ;;  %v680_v24 = vmul.f32 %v1414_v18, %v418_v46 }
 0x104   : > { %894 = vst [vmem:[%s1454_s21 + $0x598] sm:$0xff] %v638_v3  ;;  %895 = vst [vmem:[%s1454_s21 + $0x5a0] sm:$0xff] %v639_v8  ;;  %v422_v54 = vld [vmem:[%s1389_s25 + $0x708] sm:$0xff]  ;;  %v423_v55 = vld [vmem:[%s1389_s25 + $0x710] sm:$0xff]  ;;  %v669_v3 = vmul.f32 %v1414_v18, %v2507_v23  ;;  %v671_v8 = vmul.f32 %v1414_v18, %v2525_v29  ;;  %v679_v23 = vmul.f32 %v1414_v18, %v417_v45 }
 0x105   : > { %896 = vst [vmem:[%s1454_s21 + $0x5a8] sm:$0xff] %v640_v9  ;;  %897 = vst [vmem:[%s1454_s21 + $0x5b0] sm:$0xff] %v641_v10  ;;  %v424_v56 = vld [vmem:[%s1389_s25 + $0x718] sm:$0xff]  ;;  %v425_v61 = vld [vmem:[%s1389_s25 + $0x720] sm:$0xff]  ;;  %v672_v9 = vmul.f32 %v1414_v18, %v2528_v30  ;;  %v673_v10 = vmul.f32 %v1414_v18, %v2531_v31  ;;  %v683_v30 = vmul.f32 %v1414_v18, %v421_v53 }
 0x106   : > { %898 = vst [vmem:[%s1454_s21 + $0x5b8] sm:$0xff] %v642_v11  ;;  %899 = vst [vmem:[%s1454_s21 + $0x5c0] sm:$0xff] %v643_v16  ;;  %v426_v62 = vld [vmem:[%s1389_s25 + $0x728] sm:$0xff]  ;;  %v427_v63 = vld [vmem:[%s1389_s25 + $0x730] sm:$0xff]  ;;  %v674_v11 = vmul.f32 %v1414_v18, %v2534_v32  ;;  %v676_v16 = vmul.f32 %v1414_v18, %v414_v38  ;;  %v684_v31 = vmul.f32 %v1414_v18, %v422_v54 }
 0x107   : > { %900 = vst [vmem:[%s1454_s21 + $0x5c8] sm:$0xff] %v644_v17  ;;  %901 = vst [vmem:[%s1454_s21 + $0x5d0] sm:$0xff] %v645_v19  ;;  %v428_v0 = vld [vmem:[%s1389_s25 + $0x738] sm:$0xff]  ;;  %v429_v5 = vld [vmem:[%s1389_s25 + $0x740] sm:$0xff]  ;;  %v677_v17 = vmul.f32 %v1414_v18, %v415_v39  ;;  %v678_v19 = vmul.f32 %v1414_v18, %v416_v40  ;;  %v685_v32 = vmul.f32 %v1414_v18, %v423_v55 }
 0x108   : > { %902 = vst [vmem:[%s1454_s21 + $0x5d8] sm:$0xff] %v646_v20  ;;  %903 = vst [vmem:[%s1454_s21 + $0x5e0] sm:$0xff] %v647_v25  ;;  %v430_v6 = vld [vmem:[%s1389_s25 + $0x748] sm:$0xff]  ;;  %v431_v7 = vld [vmem:[%s1389_s25 + $0x750] sm:$0xff]  ;;  %v681_v25 = vmul.f32 %v1414_v18, %v419_v47  ;;  %v687_v37 = vmul.f32 %v1414_v18, %v425_v61  ;;  %v688_v38 = vmul.f32 %v1414_v18, %v426_v62 }
 0x109   : > { %904 = vst [vmem:[%s1454_s21 + $0x5e8] sm:$0xff] %v648_v26  ;;  %905 = vst [vmem:[%s1454_s21 + $0x5f0] sm:$0xff] %v649_v27  ;;  %v432_v12 = vld [vmem:[%s1389_s25 + $0x758] sm:$0xff]  ;;  %v433_v13 = vld [vmem:[%s1389_s25 + $0x760] sm:$0xff]  ;;  %v682_v26 = vmul.f32 %v1414_v18, %v420_v48  ;;  %v689_v39 = vmul.f32 %v1414_v18, %v427_v63  ;;  %v690_v40 = vmul.f32 %v1414_v18, %v428_v0 }
 0x10a   : > { %906 = vst [vmem:[%s1454_s21 + $0x5f8] sm:$0xff] %v650_v28  ;;  %907 = vst [vmem:[%s1454_s21 + $0x600] sm:$0xff] %v651_v33  ;;  %v434_v14 = vld [vmem:[%s1389_s25 + $0x768] sm:$0xff]  ;;  %v435_v20 = vld [vmem:[%s1389_s25 + $0x770] sm:$0xff]  ;;  %v686_v33 = vmul.f32 %v1414_v18, %v424_v56  ;;  %v692_v45 = vmul.f32 %v1414_v18, %v430_v6  ;;  %v693_v46 = vmul.f32 %v1414_v18, %v431_v7 }
 0x10b   : > { %908 = vst [vmem:[%s1454_s21 + $0x608] sm:$0xff] %v652_v34  ;;  %909 = vst [vmem:[%s1454_s21 + $0x610] sm:$0xff] %v653_v35  ;;  %v436_v21 = vld [vmem:[%s1389_s25 + $0x778] sm:$0xff]  ;;  %v437_v22 = vld [vmem:[%s1389_s25 + $0x780] sm:$0xff]  ;;  %v694_v47 = vmul.f32 %v1414_v18, %v432_v12  ;;  %v697_v53 = vmul.f32 %v1414_v18, %v435_v20 }
 0x10c   : > { %910 = vst [vmem:[%s1454_s21 + $0x618] sm:$0xff] %v654_v36  ;;  %911 = vst [vmem:[%s1454_s21 + $0x620] sm:$0xff] %v655_v41  ;;  %v438_v27 = vld [vmem:[%s1389_s25 + $0x788] sm:$0xff]  ;;  %v439_v28 = vld [vmem:[%s1389_s25 + $0x790] sm:$0xff]  ;;  %v698_v54 = vmul.f32 %v1414_v18, %v436_v21 }
 0x10d   : > { %912 = vst [vmem:[%s1454_s21 + $0x628] sm:$0xff] %v656_v42  ;;  %913 = vst [vmem:[%s1454_s21 + $0x630] sm:$0xff] %v657_v43  ;;  %v440_v29 = vld [vmem:[%s1389_s25 + $0x798] sm:$0xff]  ;;  %v441_v34 = vld [vmem:[%s1389_s25 + $0x7a0] sm:$0xff] }
 0x10e   : > { %914 = vst [vmem:[%s1454_s21 + $0x638] sm:$0xff] %v658_v44  ;;  %915 = vst [vmem:[%s1454_s21 + $0x640] sm:$0xff] %v659_v49  ;;  %v442_v35 = vld [vmem:[%s1389_s25 + $0x7a8] sm:$0xff]  ;;  %v443_v36 = vld [vmem:[%s1389_s25 + $0x7b0] sm:$0xff]  ;;  %v691_v44 = vmul.f32 %v1414_v18, %v429_v5  ;;  %v702_v61 = vmul.f32 %v1414_v18, %v440_v29  ;;  %v703_v62 = vmul.f32 %v1414_v18, %v441_v34 }
 0x10f   : > { %916 = vst [vmem:[%s1454_s21 + $0x648] sm:$0xff] %v660_v50  ;;  %917 = vst [vmem:[%s1454_s21 + $0x650] sm:$0xff] %v661_v51  ;;  %v444_v41 = vld [vmem:[%s1389_s25 + $0x7b8] sm:$0xff]  ;;  %v445_v42 = vld [vmem:[%s1389_s25 + $0x7c0] sm:$0xff]  ;;  %v695_v51 = vmul.f32 %v1414_v18, %v433_v13  ;;  %v704_v63 = vmul.f32 %v1414_v18, %v442_v35  ;;  %v705_v0 = vmul.f32 %v1414_v18, %v443_v36 }
 0x110   : > { %918 = vst [vmem:[%s1454_s21 + $0x658] sm:$0xff] %v662_v52  ;;  %919 = vst [vmem:[%s1454_s21 + $0x660] sm:$0xff] %v663_v57  ;;  %v446_v43 = vld [vmem:[%s1389_s25 + $0x7c8] sm:$0xff]  ;;  %v447_v48 = vld [vmem:[%s1389_s25 + $0x7d0] sm:$0xff]  ;;  %v696_v52 = vmul.f32 %v1414_v18, %v434_v14 }
 0x111   : > { %920 = vst [vmem:[%s1454_s21 + $0x668] sm:$0xff] %v664_v58  ;;  %921 = vst [vmem:[%s1454_s21 + $0x670] sm:$0xff] %v665_v59  ;;  %v448_v49 = vld [vmem:[%s1389_s25 + $0x7d8] sm:$0xff]  ;;  %v449_v50 = vld [vmem:[%s1389_s25 + $0x7e0] sm:$0xff]  ;;  %v699_v58 = vmul.f32 %v1414_v18, %v437_v22  ;;  %v700_v59 = vmul.f32 %v1414_v18, %v438_v27 }
 0x112   : > { %922 = vst [vmem:[%s1454_s21 + $0x678] sm:$0xff] %v666_v60  ;;  %923 = vst [vmem:[%s1454_s21 + $0x680] sm:$0xff] %v667_v1  ;;  %v450_v55 = vld [vmem:[%s1389_s25 + $0x7e8] sm:$0xff]  ;;  %v451_v56 = vld [vmem:[%s1389_s25 + $0x7f0] sm:$0xff]  ;;  %v701_v60 = vmul.f32 %v1414_v18, %v439_v28  ;;  %v706_v1 = vmul.f32 %v1414_v18, %v444_v41  ;;  %v710_v5 = vmul.f32 %v1414_v18, %v448_v49 }
 0x113   : > { %924 = vst [vmem:[%s1454_s21 + $0x688] sm:$0xff] %v668_v2  ;;  %925 = vst [vmem:[%s1454_s21 + $0x690] sm:$0xff] %v669_v3  ;;  %v452_v57 = vld [vmem:[%s1389_s25 + $0x7f8] sm:$0xff]  ;;  %v707_v2 = vmul.f32 %v1414_v18, %v445_v42  ;;  %v708_v3 = vmul.f32 %v1414_v18, %v446_v43  ;;  %v711_v6 = vmul.f32 %v1414_v18, %v449_v50 }
 0x114   : > { %926 = vst [vmem:[%s1454_s21 + $0x698] sm:$0xff] %v670_v4  ;;  %927 = vst [vmem:[%s1454_s21 + $0x6a0] sm:$0xff] %v671_v8  ;;  %v709_v4 = vmul.f32 %v1414_v18, %v447_v48  ;;  %v712_v7 = vmul.f32 %v1414_v18, %v450_v55  ;;  %v713_v8 = vmul.f32 %v1414_v18, %v451_v56 }
 0x115   : > { %928 = vst [vmem:[%s1454_s21 + $0x6a8] sm:$0xff] %v672_v9  ;;  %929 = vst [vmem:[%s1454_s21 + $0x6b0] sm:$0xff] %v673_v10  ;;  %v714_v9 = vmul.f32 %v1414_v18, %v452_v57 }
 0x116   : > { %930 = vst [vmem:[%s1454_s21 + $0x6b8] sm:$0xff] %v674_v11  ;;  %931 = vst [vmem:[%s1454_s21 + $0x6c0] sm:$0xff] %v675_v15 }
 0x117   : > { %932 = vst [vmem:[%s1454_s21 + $0x6c8] sm:$0xff] %v676_v16  ;;  %933 = vst [vmem:[%s1454_s21 + $0x6d0] sm:$0xff] %v677_v17 }
 0x118   : > { %934 = vst [vmem:[%s1454_s21 + $0x6d8] sm:$0xff] %v678_v19  ;;  %935 = vst [vmem:[%s1454_s21 + $0x6e0] sm:$0xff] %v679_v23 }
 0x119   : > { %936 = vst [vmem:[%s1454_s21 + $0x6e8] sm:$0xff] %v680_v24  ;;  %937 = vst [vmem:[%s1454_s21 + $0x6f0] sm:$0xff] %v681_v25 }
 0x11a   : > { %938 = vst [vmem:[%s1454_s21 + $0x6f8] sm:$0xff] %v682_v26  ;;  %939 = vst [vmem:[%s1454_s21 + $0x700] sm:$0xff] %v683_v30 }
 0x11b   : > { %940 = vst [vmem:[%s1454_s21 + $0x708] sm:$0xff] %v684_v31  ;;  %941 = vst [vmem:[%s1454_s21 + $0x710] sm:$0xff] %v685_v32 }
 0x11c   : > { %942 = vst [vmem:[%s1454_s21 + $0x718] sm:$0xff] %v686_v33  ;;  %943 = vst [vmem:[%s1454_s21 + $0x720] sm:$0xff] %v687_v37 }
 0x11d   : > { %944 = vst [vmem:[%s1454_s21 + $0x728] sm:$0xff] %v688_v38  ;;  %945 = vst [vmem:[%s1454_s21 + $0x730] sm:$0xff] %v689_v39 }
 0x11e   : > { %946 = vst [vmem:[%s1454_s21 + $0x738] sm:$0xff] %v690_v40  ;;  %947 = vst [vmem:[%s1454_s21 + $0x740] sm:$0xff] %v691_v44 }
 0x11f   : > { %948 = vst [vmem:[%s1454_s21 + $0x748] sm:$0xff] %v692_v45  ;;  %949 = vst [vmem:[%s1454_s21 + $0x750] sm:$0xff] %v693_v46 }
 0x120   : > { %950 = vst [vmem:[%s1454_s21 + $0x758] sm:$0xff] %v694_v47  ;;  %951 = vst [vmem:[%s1454_s21 + $0x760] sm:$0xff] %v695_v51 }
 0x121   : > { %952 = vst [vmem:[%s1454_s21 + $0x768] sm:$0xff] %v696_v52  ;;  %953 = vst [vmem:[%s1454_s21 + $0x770] sm:$0xff] %v697_v53 }
 0x122   : > { %954 = vst [vmem:[%s1454_s21 + $0x778] sm:$0xff] %v698_v54  ;;  %955 = vst [vmem:[%s1454_s21 + $0x780] sm:$0xff] %v699_v58 }
 0x123   : > { %956 = vst [vmem:[%s1454_s21 + $0x788] sm:$0xff] %v700_v59  ;;  %957 = vst [vmem:[%s1454_s21 + $0x790] sm:$0xff] %v701_v60 }
 0x124   : > { %958 = vst [vmem:[%s1454_s21 + $0x798] sm:$0xff] %v702_v61  ;;  %959 = vst [vmem:[%s1454_s21 + $0x7a0] sm:$0xff] %v703_v62 }
 0x125   : > { %960 = vst [vmem:[%s1454_s21 + $0x7a8] sm:$0xff] %v704_v63  ;;  %961 = vst [vmem:[%s1454_s21 + $0x7b0] sm:$0xff] %v705_v0 }
 0x126   : > { %962 = vst [vmem:[%s1454_s21 + $0x7b8] sm:$0xff] %v706_v1  ;;  %963 = vst [vmem:[%s1454_s21 + $0x7c0] sm:$0xff] %v707_v2 }
 0x127   : > { %964 = vst [vmem:[%s1454_s21 + $0x7c8] sm:$0xff] %v708_v3  ;;  %965 = vst [vmem:[%s1454_s21 + $0x7d0] sm:$0xff] %v709_v4 }
 0x128   : > { %966 = vst [vmem:[%s1454_s21 + $0x7d8] sm:$0xff] %v710_v5  ;;  %967 = vst [vmem:[%s1454_s21 + $0x7e0] sm:$0xff] %v711_v6 }
 0x129   : > { %968 = vst [vmem:[%s1454_s21 + $0x7e8] sm:$0xff] %v712_v7  ;;  %969 = vst [vmem:[%s1454_s21 + $0x7f0] sm:$0xff] %v713_v8 }
 0x12a   : > { %970 = vst [vmem:[%s1454_s21 + $0x7f8] sm:$0xff] %v714_v9 }
 0x12b   : > { %1210 = shalt.err (!%p1207_p3)
}
 0x12c   : > { %s1211_s15 = scalar_lea.hbm %s2733_s3, 32768  ;;  %s1215_s19 = scalar_lea.hbm %s2791_s2, 65536 }
 0x12d   : > { %p1212_p5 = scmp.ne.s32.totalorder %s2733_s3, %s1211_s15  ;;  %p1216_p10 = scmp.lt.s32.totalorder %s2733_s3, %s2791_s2 }
 0x12e   : > { %p1217_p4 = scmp.lt.s32.totalorder %s1215_s19, %s1211_s15 }
 0x12f   : > { %p1213_p6 = pnand %p1212_p5, %p1348_p9 }
 0x130   : > { %p1218_p13 = por %p1217_p4, %p1216_p10 }
 0x131   : > { %p1214_p7 = pneg %p1213_p6 }
 0x133   : > { %p1219_p8 = pnand %p1218_p13, %p1214_p7 }
 0x135   : > { %1222 = shalt.err (!%p1219_p8)
}
 0x136   : > { %1107 = dma.vmem_to_hbm [thread:$0]  (%p1348_p9), %s2735_s29, 32768, %s2733_s3, %s972_s4  }
 0x137 PF: > { %s1000_s26 = sand.u32 1, %s1257_s9   ;;  %p2797_p11 = scmp.ne.s32.totalorder %s2795_s24, 0 }
 0x138   : > { %p2798_p12 = scmp.ge.s32.totalorder %s1277_s14, 2  ;;  %s1001_s27 = scalar_lea.sflag [#allocation4], %s1000_s26 }
 0x13a   : > { %p1114_p0 = pnand %p2798_p12, %p2797_p11 }
 0x13c   : > { %p1115_p1 = pneg %p1114_p0 }
 0x13e   : > { %1252 = dma.done.wait (%p1115_p1), %s1001_s27, 32768  }
 0x13f   : > { %1254 = vsyncadd (%p1115_p1), %s1001_s27, 4294934528  ;;  %s18_s14 = sadd.s32 1, %s1277_s14   ;;  %s2799_s9 = smov %s1261_s10 }
 0x140   : > { %p15_p2 = scmp.ge.s32.totalorder %s18_s14, 4   ;;  %s2800_s10 = smov %s1265_s11 }
 0x141   : > { %s2801_s11 = smov %s1353_s23  ;;  %s2802_s12 = smov %s1273_s13 }
 0x142   : > { %s2803_s13 = smov %s2805_s17  ;;  %17 = sbr.rel (!%p15_p2) target bundleno = 6 (0x6), region = 76 }
 0x147   :  { %1006 = vsyncpa [#allocation3], 1 }
 0x148   :  { %1008 = vsyncpa [#allocation3 + $0x1], 1 }
 0x149   :  { %1009 = vsyncpa [#allocation4], 1 }
 0x14a   :  { %1011 = vsyncpa [#allocation4 + $0x1], 1 }

</bundles_post_ra>
